<compile_context>
chip_gen: v6e
topology: v6e:2x2x1
jax: 0.10.0
libtpu: 0.0.40
codegen_flags: <defaults>
</compile_context>

<pallas_src>
import functools

import jax
import jax.numpy as jnp
from jax.experimental import pallas as pl
from jax.experimental.pallas import tpu as pltpu


def _affine_bounds_kernel(w_ref, cr_ref, bias_ref, out_ref, *, tk):
    """One (out-tile n, reduction-tile k) grid step.

    w_ref:    (tn, tk)      weight tile, native (out, in) layout (streamed)
    cr_ref:   (2, in_pad)   fully-resident [center; radius] rows of the bounds
    bias_ref: (1, tn)       bias tile
    out_ref:  (2, tn)       f32 output block, revisited across k (accumulator)
    """
    k = pl.program_id(1)

    @pl.when(k == 0)
    def _init():
        # Fold the bias in at the first reduction step.
        out_ref[...] = jnp.broadcast_to(bias_ref[...], out_ref.shape)

    # Slice the k-th chunk out of the resident center/radius rows.
    if tk == cr_ref.shape[1]:            # single k block: static full-row view
        c = cr_ref[0:1, :]
        r = cr_ref[1:2, :]
    else:                                # tk is a multiple of 128 here
        koff = pl.multiple_of(k * tk, 128)
        c = cr_ref[0:1, pl.ds(koff, tk)]
        r = cr_ref[1:2, pl.ds(koff, tk)]

    w = w_ref[...]
    # Contract the shared tk axis: (1, tk) x (tn, tk) -> (1, tn).
    dn = (((1,), (1,)), ((), ()))
    wc = jax.lax.dot_general(c, w, dn, preferred_element_type=jnp.float32)
    wr = jax.lax.dot_general(r, jnp.abs(w), dn, preferred_element_type=jnp.float32)

    # row 0: lower = W@c - |W|@r ; row 1: upper = W@c + |W|@r
    out_ref[...] += jnp.concatenate([wc - wr, wc + wr], axis=0)


def _round_up(x, m):
    return ((x + m - 1) // m) * m


def _pick_tile(dim, target, align=128, floor=128):
    """Pick (tile, padded_dim): full dim if it fits `target`, else the
    `align`-multiple tile in [floor, target] minimizing zero padding."""
    if dim <= target:
        return dim, dim
    best_t, best_pad = None, None
    t = (target // align) * align
    while t >= floor:
        pad = -dim % t
        if best_pad is None or pad < best_pad:
            best_t, best_pad = t, pad
        if pad == 0:
            break                         # largest aligned divisor <= target
        t -= align
    return best_t, dim + best_pad


def _plan(out_dim, in_dim, tn, tk):
    """Static tiling plan: (TN, TK, out_padded, in_padded)."""
    if tn is None and tk is None and out_dim * in_dim * 4 <= (2 << 20):
        # Tiny layer: a single grid step is strictly faster (~0.35us/step).
        return out_dim, in_dim, out_dim, in_dim
    if tn is None:
        TN, out_p = _pick_tile(out_dim, target=256, align=128, floor=128)
        # v7x shards the "parallel" axis over 2 TensorCores: prefer >= 2 blocks.
        if out_p // TN < 2 and TN % 256 == 0:
            TN //= 2
    else:
        TN = tn
        out_p = _round_up(out_dim, TN)
        assert TN % 128 == 0 or TN == out_p, "tn must be a multiple of 128"
    if tk is None:
        TK, in_p = _pick_tile(in_dim, target=2048, align=128, floor=512)
    else:
        TK = tk
        in_p = _round_up(in_dim, TK)
        assert TK % 128 == 0 or TK == in_p, "tk must be a multiple of 128"
    return TN, TK, out_p, in_p


@functools.partial(jax.jit, static_argnames=("tn", "tk"))
def deep_poly_affine_forward(weights, bias, bounds, *, tn=None, tk=None):
    """Pallas implementation of DeepPolyAffineLayer.forward (back_subs == 0).

    weights: (out_dim, in_dim) f32, bias: (out_dim,) or None,
    bounds:  (2, in_dim) with row 0 = lower, row 1 = upper.
    Returns (2, out_dim) f32 [lower; upper].
    """
    out_dim, in_dim = weights.shape
    assert bounds.shape == (2, in_dim)

    TN, TK, out_p, in_p = _plan(out_dim, in_dim, tn, tk)

    w = weights.astype(jnp.float32)
    if (out_p, in_p) != (out_dim, in_dim):
        # Zero padding contributes exactly 0 to every bound.
        w = jnp.pad(w, ((0, out_p - out_dim), (0, in_p - in_dim)))

    lo = bounds[0].astype(jnp.float32)
    hi = bounds[1].astype(jnp.float32)
    cr = jnp.stack([(lo + hi) * 0.5, (hi - lo) * 0.5], axis=0)   # [center; radius]
    if in_p != in_dim:
        cr = jnp.pad(cr, ((0, 0), (0, in_p - in_dim)))

    if bias is None:
        b2 = jnp.zeros((1, out_p), jnp.float32)
    else:
        b2 = bias.astype(jnp.float32).reshape(1, out_dim)
        if out_p != out_dim:
            b2 = jnp.pad(b2, ((0, 0), (0, out_p - out_dim)))

    grid = (out_p // TN, in_p // TK)
    out = pl.pallas_call(
        functools.partial(_affine_bounds_kernel, tk=TK),
        out_shape=jax.ShapeDtypeStruct((2, out_p), jnp.float32),
        grid_spec=pltpu.PrefetchScalarGridSpec(
            num_scalar_prefetch=0,
            grid=grid,
            in_specs=[
                pl.BlockSpec((TN, TK), lambda n, k: (n, k)),    # weights: streamed
                pl.BlockSpec((2, in_p), lambda n, k: (0, 0)),   # center/radius: resident
                pl.BlockSpec((1, TN), lambda n, k: (0, n)),     # bias
            ],
            out_specs=pl.BlockSpec((2, TN), lambda n, k: (0, n)),
        ),
        compiler_params=pltpu.CompilerParams(
            dimension_semantics=("parallel", "arbitrary"),
            vmem_limit_bytes=32 * 1024 * 1024,
        ),
    )(w, cr, b2)

    if out_p != out_dim:
        out = out[:, :out_dim]
    return out


def _reference(weights, bias, bounds):
    w_pos = jnp.maximum(weights, 0.0)
    w_neg = jnp.minimum(weights, 0.0)
    lower = w_pos @ bounds[0] + w_neg @ bounds[1]
    upper = w_pos @ bounds[1] + w_neg @ bounds[0]
    out = jnp.stack([lower, upper], 0)
    if bias is not None:
        out = out + bias.reshape(1, -1)
    return out


def _check(key, out_dim, in_dim, tn=None, tk=None, use_bias=True):
    k_w, k_b, k_lo, k_rad = jax.random.split(key, 4)
    weights = jax.random.normal(k_w, (out_dim, in_dim), dtype=jnp.float32) * 0.1
    bias = (jax.random.normal(k_b, (out_dim,), dtype=jnp.float32) * 0.1
            if use_bias else None)
    lower = jax.random.normal(k_lo, (in_dim,), dtype=jnp.float32)
    radius = jax.random.uniform(k_rad, (in_dim,), dtype=jnp.float32)
    bounds = jnp.stack([lower, lower + radius], 0)

    out = jax.block_until_ready(
        deep_poly_affine_forward(weights, bias, bounds, tn=tn, tk=tk))
    ref = _reference(weights, bias, bounds)
    assert out.shape == (2, out_dim)
    assert jnp.allclose(out, ref, atol=1e-4, rtol=1e-4), "mismatch vs reference"
    # sanity: upper bound must dominate lower bound
    assert bool(jnp.all(out[1] >= out[0] - 1e-5))


if __name__ == "__main__":
    root = jax.random.PRNGKey(0)
    k0, k1, k2 = jax.random.split(root, 3)

    # 1) Small layer: tiny-problem fast path (single grid step, no padding).
    _check(k0, out_dim=128, in_dim=256)

    # 2) Forced small tiles: exercises the multi-block grid / k-accumulation
    #    path and the >=2-block parallel axis.
    _check(k1, out_dim=256, in_dim=512, tn=128, tk=128)

    # 3) Auto tiling with a non-128-divisible reduction dim: exercises tile
    #    selection, zero padding, and the resident-bounds dynamic slice.
    _check(k2, out_dim=256, in_dim=2176, use_bias=True)

    print("KERNEL_OK")
</pallas_src>

<mosaic_0001>
module attributes {stable_mosaic.version = 11 : i64} {
  func.func @_affine_bounds_kernel(%arg0: i32, %arg1: i32, %arg2: memref<128x256xf32, #tpu.memory_space<vmem>>, %arg3: memref<2x256xf32, #tpu.memory_space<vmem>>, %arg4: memref<1x128xf32, #tpu.memory_space<vmem>>, %arg5: memref<2x128xf32, #tpu.memory_space<vmem>>) attributes {dimension_semantics = [#tpu.dimension_semantics<parallel>, #tpu.dimension_semantics<arbitrary>], iteration_bounds = array<i64: 1, 1>, scalar_prefetch = 0 : i64, scratch_operands = 0 : i64, tpu.core_type = #tpu.core_type<tc>, window_params = [{transform_indices = @transform_0, window_bounds = array<i64: 128, 256>}, {pipeline_mode = #tpu.pipeline_mode<synchronous>, transform_indices = @transform_1, window_bounds = array<i64: 2, 256>}, {transform_indices = @transform_2, window_bounds = array<i64: 1, 128>}, {transform_indices = @transform_3, window_bounds = array<i64: 2, 128>}]} {
    %c0_i32 = arith.constant 0 : i32
    %0 = arith.cmpi eq, %arg1, %c0_i32 : i32
    %1 = arith.extui %0 : i1 to i32
    %c0_i32_0 = arith.constant 0 : i32
    %2 = arith.cmpi ne, %1, %c0_i32_0 : i32
    scf.if %2 {
      %c0_10 = arith.constant 0 : index
      %c0_11 = arith.constant 0 : index
      %15 = vector.load %arg4[%c0_10, %c0_11] : memref<1x128xf32, #tpu.memory_space<vmem>>, vector<1x128xf32>
      %16 = vector.shape_cast %15 : vector<1x128xf32> to vector<1x128xf32>
      %17 = vector.broadcast %16 : vector<1x128xf32> to vector<2x128xf32>
      %c0_12 = arith.constant 0 : index
      %c0_13 = arith.constant 0 : index
      %18 = vector.load %arg5[%c0_12, %c0_13] : memref<2x128xf32, #tpu.memory_space<vmem>>, vector<2x128xf32>
      tpu.vector_store %arg5[%c0_12, %c0_13], %17 {strides = array<i32>} : memref<2x128xf32, #tpu.memory_space<vmem>>, vector<2x128xf32>,
    } else {
    }
    %c0 = arith.constant 0 : index
    %c0_1 = arith.constant 0 : index
    %3 = vector.load %arg3[%c0, %c0_1] : memref<2x256xf32, #tpu.memory_space<vmem>>, vector<1x256xf32>
    %c1 = arith.constant 1 : index
    %c0_2 = arith.constant 0 : index
    %4 = vector.load %arg3[%c1, %c0_2] : memref<2x256xf32, #tpu.memory_space<vmem>>, vector<1x256xf32>
    %c0_3 = arith.constant 0 : index
    %c0_4 = arith.constant 0 : index
    %5 = vector.load %arg2[%c0_3, %c0_4] : memref<128x256xf32, #tpu.memory_space<vmem>>, vector<128x256xf32>
    %cst = arith.constant dense<0.000000e+00> : vector<1x128xf32>
    %6 = tpu.matmul %3, %5, %cst {dimension_numbers = #tpu.dot_dimension_numbers<[1], [1], [0], [0], [0, 0, 1, 0], [], []>} : vector<1x256xf32>, vector<128x256xf32>, vector<1x128xf32> -> vector<1x128xf32>
    %7 = math.absf %5 : vector<128x256xf32>
    %cst_5 = arith.constant dense<0.000000e+00> : vector<1x128xf32>
    %8 = tpu.matmul %4, %7, %cst_5 {dimension_numbers = #tpu.dot_dimension_numbers<[1], [1], [0], [0], [0, 0, 1, 0], [], []>} : vector<1x256xf32>, vector<128x256xf32>, vector<1x128xf32> -> vector<1x128xf32>
    %c0_6 = arith.constant 0 : index
    %c0_7 = arith.constant 0 : index
    %9 = vector.load %arg5[%c0_6, %c0_7] : memref<2x128xf32, #tpu.memory_space<vmem>>, vector<2x128xf32>
    %10 = arith.subf %6, %8 : vector<1x128xf32>
    %11 = arith.addf %6, %8 : vector<1x128xf32>
    %12 = tpu.concatenate %10, %11 in 0 : vector<1x128xf32>, vector<1x128xf32> -> vector<2x128xf32>
    %13 = arith.addf %9, %12 : vector<2x128xf32>
    %c0_8 = arith.constant 0 : index
    %c0_9 = arith.constant 0 : index
    %14 = vector.load %arg5[%c0_8, %c0_9] : memref<2x128xf32, #tpu.memory_space<vmem>>, vector<2x128xf32>
    tpu.vector_store %arg5[%c0_8, %c0_9], %13 {strides = array<i32>} : memref<2x128xf32, #tpu.memory_space<vmem>>, vector<2x128xf32>,
    return
  }
  func.func @transform_0(%arg0: i32, %arg1: i32) -> (i32, i32) {
    %c0_i32 = arith.constant 0 : i32
    return %arg0, %arg1 : i32, i32
  }
  func.func @transform_1(%arg0: i32, %arg1: i32) -> (i32, i32) {
    %c0_i32 = arith.constant 0 : i32
    %c0_i32_0 = arith.constant 0 : i32
    %c0_i32_1 = arith.constant 0 : i32
    return %c0_i32, %c0_i32_0 : i32, i32
  }
  func.func @transform_2(%arg0: i32, %arg1: i32) -> (i32, i32) {
    %c0_i32 = arith.constant 0 : i32
    %c0_i32_0 = arith.constant 0 : i32
    return %c0_i32, %arg0 : i32, i32
  }
  func.func @transform_3(%arg0: i32, %arg1: i32) -> (i32, i32) {
    %c0_i32 = arith.constant 0 : i32
    %c0_i32_0 = arith.constant 0 : i32
    return %c0_i32, %arg0 : i32, i32
  }
}

</mosaic_0001>

<bundles_post_ra>
// kernel: deep_poly_affine_forward.1
= control target key start
LH: loop header
LB: loop body
LE: loop exit
PB: predicated region body
PF: predicated region fallthrough
CT: control target
= control target key end

     0   :  { %8 = vsyncpa [#allocation3], 0  ;;  %s396_s0 = inlined_call_operand.hbm [shape: f32[128,256], index: 0, kind: input, shape index: {}]   ;;  %s397_s1 = inlined_call_operand.vmem [shape: f32[2,256], index: 1, kind: input, shape index: {}]   ;;  %s398_s2 = inlined_call_operand.vmem [shape: f32[1,128], index: 2, kind: input, shape index: {}]   ;;  %s399_s3 = inlined_call_operand.hbm [shape: f32[2,128], index: 3, kind: output, shape index: {}]  }
   0x1   :  { %9 = vsyncpa [#allocation4], 0  ;;  %s345_s12 = smov [#allocation2]  }
   0x2   :  { %s15_s13 = sshll.u32 %s345_s12, 4  ;;  %s16_s13 = int_to_ptr.vmem [resolvable:$true] %s15_s13 }
   0x3   :  { %s309_s14 = scalar_lea.vmem %s16_s13, 4096  ;;  %p314_p1 = scmp.lt.s32.totalorder %s16_s13, %s16_s13 }
   0x4   :  { %p310_p0 = scmp.ne.s32.totalorder %s16_s13, %s309_s14  ;;  %p315_p2 = scmp.lt.s32.totalorder %s309_s14, %s309_s14 }
   0x6   :  { %p316_p3 = por %p315_p2, %p314_p1 }
   0x8   :  { %p317_p4 = pnand %p316_p3, %p310_p0 }
   0xa   :  { %320 = shalt.err (!%p317_p4)
}
   0xb   :  { %s346_s15 = smov 256   ;;  %s347_s16 = smov 16  }
   0xc   :  { %21 = dma.hbm_to_vmem [thread:$0]  %s396_s0, 4096, %s16_s13, [#allocation3], %s346_s15, %s346_s15, %s347_s16  }
   0xd   :  { %341 = dma.done.wait [#allocation3], 4096  }
   0xe   :  { %342 = vsyncadd [#allocation3], 4294963200  ;;  %v75_v0 = vld [vmem:[#allocation2 + $0xf8] sm:$0xff]  ;;  %v74_v1 = vld [vmem:[#allocation2 + $0xf0] sm:$0xff]  ;;  %v77_v15 = vlaneseq  ;;  %vm276_vm0 = vcmask 1040384   ;;  %s348_s23 = smov [#allocation5]  }
   0xf   :  { %v73_v2 = vld [vmem:[#allocation2 + $0xe8] sm:$0xff]  ;;  %87 = vmatprep.subr.mxu0 %v75_v0  ;;  %v188_v3 = vand.u32 2147483647, %v75_v0  ;;  %v187_v4 = vand.u32 2147483647, %v74_v1  ;;  %v72_v6 = vld [vmem:[#allocation2 + $0xe0] sm:$0xff] }
  0x10   :  { %v186_v5 = vand.u32 2147483647, %v73_v2  ;;  %88 = vmatpush1.xpose.msra.mxu0 %v74_v1  ;;  %v71_v7 = vld [vmem:[#allocation2 + $0xd8] sm:$0xff]  ;;  %v185_v8 = vand.u32 2147483647, %v72_v6  ;;  %v70_v10 = vld [vmem:[#allocation2 + $0xd0] sm:$0xff] }
  0x11   :  { %200 = vmatprep.subr.mxu1 %v188_v3  ;;  %89 = vmatprep.subr.mxu0 %v73_v2  ;;  %v184_v9 = vand.u32 2147483647, %v71_v7  ;;  %v69_v11 = vld [vmem:[#allocation2 + $0xc8] sm:$0xff]  ;;  %v183_v12 = vand.u32 2147483647, %v70_v10  ;;  %v68_v14 = vld [vmem:[#allocation2 + $0xc0] sm:$0xff] }
  0x12   :  { %201 = vmatpush1.xpose.msra.mxu1 %v187_v4  ;;  %v182_v13 = vand.u32 2147483647, %v69_v11  ;;  %v67_v16 = vld [vmem:[#allocation2 + $0xb8] sm:$0xff]  ;;  %v181_v17 = vand.u32 2147483647, %v68_v14  ;;  %v66_v19 = vld [vmem:[#allocation2 + $0xb0] sm:$0xff] }
  0x13   :  { %202 = vmatprep.subr.mxu1 %v186_v5  ;;  %v180_v18 = vand.u32 2147483647, %v67_v16  ;;  %v372_v20 = vshrl.u32 %v77_v15, 7  ;;  %v65_v21 = vld [vmem:[#allocation2 + $0xa8] sm:$0xff]  ;;  %v179_v22 = vand.u32 2147483647, %v66_v19 }
  0x14   :  { %90 = vmatpush1.xpose.msra.mxu0 %v72_v6  ;;  %v178_v23 = vand.u32 2147483647, %v65_v21  ;;  %v64_v24 = vld [vmem:[#allocation2 + $0xa0] sm:$0xff]  ;;  %v63_v26 = vld [vmem:[#allocation2 + $0x98] sm:$0xff]  ;;  %v62_v30 = vld [vmem:[#allocation2 + $0x90] sm:$0xff]  ;;  %s286_s24 = sshll.u32 %s348_s23, 4  ;;  %s287_s24 = int_to_ptr.vmem [resolvable:$true] %s286_s24 }
  0x15   :  { %91 = vmatprep.subr.mxu0 %v71_v7  ;;  %v83_v25 = vsub.s32 1, %v372_v20  ;;  %v177_v27 = vand.u32 2147483647, %v64_v24  ;;  %v378_v28 = vld [vmem:[%s397_s1] ss:$2 sm:$0x3]  ;;  %p326_p6 = scmp.lt.s32.totalorder %s287_s24, %s287_s24 }
  0x16   :  { %203 = vmatpush1.xpose.msra.mxu1 %v185_v8  ;;  %v176_v29 = vand.u32 2147483647, %v63_v26  ;;  %v61_v32 = vld [vmem:[#allocation2 + $0x88] sm:$0xff]  ;;  %v384_v33 = vld [vmem:[%s397_s1 + $0x1] ss:$2 sm:$0x3] }
  0x17   :  { %204 = vmatprep.subr.mxu1 %v184_v9  ;;  %v84_v31 = vrot.slane %v378_v28, %v83_v25  ;;  %v197_v34 = vrot.slane %v384_v33, %v83_v25  ;;  %v175_v35 = vand.u32 2147483647, %v62_v30  ;;  %v174_v36 = vand.u32 2147483647, %v61_v32  ;;  %v60_v37 = vld [vmem:[#allocation2 + $0x80] sm:$0xff]  ;;  %v59_v38 = vld [vmem:[#allocation2 + $0x78] sm:$0xff] }
  0x18   :  { %92 = vmatpush1.xpose.msra.mxu0 %v70_v10  ;;  %v173_v39 = vand.u32 2147483647, %v60_v37  ;;  %v172_v40 = vand.u32 2147483647, %v59_v38  ;;  %v58_v41 = vld [vmem:[#allocation2 + $0x70] sm:$0xff]  ;;  %v57_v42 = vld [vmem:[#allocation2 + $0x68] sm:$0xff] }
  0x19   :  { %93 = vmatprep.subr.mxu0 %v69_v11  ;;  %151 = vmatprep.mubr.f32.mxu0 %v84_v31  ;;  %v171_v43 = vand.u32 2147483647, %v58_v41  ;;  %v170_v44 = vand.u32 2147483647, %v57_v42  ;;  %v56_v45 = vld [vmem:[#allocation2 + $0x60] sm:$0xff]  ;;  %v55_v46 = vld [vmem:[#allocation2 + $0x58] sm:$0xff] }
  0x1a   :  { %205 = vmatpush1.xpose.msra.mxu1 %v183_v12  ;;  %264 = vmatprep.mubr.f32.mxu1 %v197_v34  ;;  %v169_v47 = vand.u32 2147483647, %v56_v45  ;;  %v168_v48 = vand.u32 2147483647, %v55_v46  ;;  %v54_v49 = vld [vmem:[#allocation2 + $0x50] sm:$0xff]  ;;  %v53_v50 = vld [vmem:[#allocation2 + $0x48] sm:$0xff] }
  0x1b   :  { %206 = vmatprep.subr.mxu1 %v182_v13  ;;  %v167_v51 = vand.u32 2147483647, %v54_v49  ;;  %v166_v52 = vand.u32 2147483647, %v53_v50  ;;  %v52_v53 = vld [vmem:[#allocation2 + $0x40] sm:$0xff]  ;;  %v51_v54 = vld [vmem:[#allocation2 + $0x38] sm:$0xff] }
  0x1c   :  { %94 = vmatpush1.xpose.msra.mxu0 %v68_v14  ;;  %v165_v55 = vand.u32 2147483647, %v52_v53  ;;  %v164_v56 = vand.u32 2147483647, %v51_v54  ;;  %v50_v57 = vld [vmem:[#allocation2 + $0x30] sm:$0xff]  ;;  %v49_v58 = vld [vmem:[#allocation2 + $0x28] sm:$0xff] }
  0x1d   :  { %95 = vmatprep.subr.mxu0 %v67_v16  ;;  %v163_v59 = vand.u32 2147483647, %v50_v57  ;;  %v162_v60 = vand.u32 2147483647, %v49_v58  ;;  %v48_v61 = vld [vmem:[#allocation2 + $0x20] sm:$0xff]  ;;  %v47_v62 = vld [vmem:[#allocation2 + $0x18] sm:$0xff] }
  0x1e   :  { %207 = vmatpush1.xpose.msra.mxu1 %v181_v17  ;;  %v161_v63 = vand.u32 2147483647, %v48_v61  ;;  %v160_v0 = vand.u32 2147483647, %v47_v62  ;;  %v46_v1 = vld [vmem:[#allocation2 + $0x10] sm:$0xff]  ;;  %v45_v2 = vld [vmem:[#allocation2 + $0x8] sm:$0xff] }
  0x1f   :  { %208 = vmatprep.subr.mxu1 %v180_v18  ;;  %v159_v3 = vand.u32 2147483647, %v46_v1  ;;  %v158_v4 = vand.u32 2147483647, %v45_v2  ;;  %v44_v5 = vld [vmem:[#allocation2] sm:$0xff]  ;;  %v79_v6 = vsub.s32 0, %v372_v20 }
  0x20   :  { %96 = vmatpush1.xpose.msra.mxu0 %v66_v19  ;;  %v157_v7 = vand.u32 2147483647, %v44_v5  ;;  %v295_v10 = vld [vmem:[%s398_s2] ss:$0 sm:$0xff]  ;;  %s321_s25 = scalar_lea.vmem %s287_s24, 32 }
  0x21   :  { %97 = vmatprep.subr.mxu0 %v65_v21  ;;  %v80_v8 = vrot.slane %v378_v28, %v79_v6  ;;  %v193_v9 = vrot.slane %v384_v33, %v79_v6  ;;  %40 = vst [vmem:[#allocation5] sm:$0x3] %v295_v10  ;;  %p322_p5 = scmp.ne.s32.totalorder %s287_s24, %s321_s25  ;;  %p327_p7 = scmp.lt.s32.totalorder %s321_s25, %s321_s25 }
  0x22   :  { %209 = vmatpush1.xpose.msra.mxu1 %v179_v22 }
  0x23   :  { %210 = vmatprep.subr.mxu1 %v178_v23  ;;  %p328_p8 = por %p327_p7, %p326_p6 }
  0x24   :  { %98 = vmatpush1.xpose.msra.mxu0 %v64_v24 }
  0x25   :  { %99 = vmatprep.subr.mxu0 %v63_v26  ;;  %p329_p9 = pnand %p328_p8, %p322_p5 }
  0x26   :  { %211 = vmatpush1.xpose.msra.mxu1 %v177_v27 }
  0x27   :  { %212 = vmatprep.subr.mxu1 %v176_v29 }
  0x28   :  { %100 = vmatpush1.xpose.msra.mxu0 %v62_v30  ;;  %v270_v18 = vld [vmem:[#allocation5] sm:$0x3] }
  0x29   :  { %101 = vmatprep.subr.mxu0 %v61_v32 }
  0x2a   :  { %213 = vmatpush1.xpose.msra.mxu1 %v175_v35 }
  0x2b   :  { %214 = vmatprep.subr.mxu1 %v174_v36 }
  0x2c   :  { %102 = vmatpush1.xpose.msra.mxu0 %v60_v37 }
  0x2d   :  { %103 = vmatprep.subr.mxu0 %v59_v38 }
  0x2e   :  { %215 = vmatpush1.xpose.msra.mxu1 %v173_v39 }
  0x2f   :  { %216 = vmatprep.subr.mxu1 %v172_v40 }
  0x30   :  { %104 = vmatpush1.xpose.msra.mxu0 %v58_v41 }
  0x31   :  { %105 = vmatprep.subr.mxu0 %v57_v42 }
  0x32   :  { %217 = vmatpush1.xpose.msra.mxu1 %v171_v43 }
  0x33   :  { %218 = vmatprep.subr.mxu1 %v170_v44 }
  0x34   :  { %106 = vmatpush1.xpose.msra.mxu0 %v56_v45 }
  0x35   :  { %107 = vmatprep.subr.mxu0 %v55_v46 }
  0x36   :  { %219 = vmatpush1.xpose.msra.mxu1 %v169_v47 }
  0x37   :  { %220 = vmatprep.subr.mxu1 %v168_v48 }
  0x38   :  { %108 = vmatpush1.xpose.msra.mxu0 %v54_v49 }
  0x39   :  { %109 = vmatprep.subr.mxu0 %v53_v50 }
  0x3a   :  { %221 = vmatpush1.xpose.msra.mxu1 %v167_v51 }
  0x3b   :  { %222 = vmatprep.subr.mxu1 %v166_v52 }
  0x3c   :  { %110 = vmatpush1.xpose.msra.mxu0 %v52_v53 }
  0x3d   :  { %111 = vmatprep.subr.mxu0 %v51_v54 }
  0x3e   :  { %223 = vmatpush1.xpose.msra.mxu1 %v165_v55 }
  0x3f   :  { %224 = vmatprep.subr.mxu1 %v164_v56 }
  0x40   :  { %112 = vmatpush1.xpose.msra.mxu0 %v50_v57 }
  0x41   :  { %113 = vmatprep.subr.mxu0 %v49_v58 }
  0x42   :  { %225 = vmatpush1.xpose.msra.mxu1 %v163_v59 }
  0x43   :  { %226 = vmatprep.subr.mxu1 %v162_v60 }
  0x44   :  { %114 = vmatpush1.xpose.msra.mxu0 %v48_v61 }
  0x45   :  { %115 = vmatprep.subr.mxu0 %v47_v62 }
  0x46   :  { %227 = vmatpush1.xpose.msra.mxu1 %v161_v63 }
  0x47   :  { %228 = vmatprep.subr.mxu1 %v160_v0 }
  0x48   :  { %116 = vmatpush1.xpose.msra.mxu0 %v46_v1 }
  0x49   :  { %117 = vmatprep.subr.mxu0 %v45_v2 }
  0x4a   :  { %229 = vmatpush1.xpose.msra.mxu1 %v159_v3 }
  0x4b   :  { %230 = vmatprep.subr.mxu1 %v158_v4 }
  0x4c   :  { %118 = vmatpush1.xpose.msra.mxu0 %v44_v5 }
  0x4e   :  { %231 = vmatpush1.xpose.msra.mxu1 %v157_v7 }
  0x4f   :  { %152 = vmatmul.mubr.f32.vlgmr.msra.gmra.mxu0 %v80_v8 }
  0x51   :  { %265 = vmatmul.mubr.f32.vlgmr.msra.gmra.mxu1 %v193_v9 }
 0x10f   :  { %v153_v11 = vpop.f32.mrf.mxu0 }
 0x111   :  { %v155_v12 = vpop.f32.mrf.mxu0  ;;  %v266_v13 = vpop.f32.mrf.mxu1 }
 0x112   :  { %v272_v14 = vadd.f32 %v266_v13, %v153_v11  ;;  %v271_v16 = vsub.f32 %v153_v11, %v266_v13 }
 0x113   :  { %v268_v15 = vpop.f32.mrf.mxu1 }
 0x114   :  { %v274_v17 = vrot.slane %v272_v14, 7 }
 0x116   :  { %v277_v19 = vsel %vm276_vm0, %v271_v16, %v274_v17 }
 0x117   :  { %v278_v20 = vadd.f32 %v277_v19, %v270_v18 }
 0x119   :  { %279 = vst [vmem:[#allocation5] sm:$0x3] %v278_v20 }
 0x11a   :  { %332 = shalt.err (!%p329_p9)
}
 0x11b   :  { %289 = dma.vmem_to_hbm [thread:$0]  %s287_s24, 32, %s399_s3, [#allocation4]  }
 0x11c   :  { %343 = dma.done.wait [#allocation4], 32  }
 0x11d   :  { %344 = vsyncadd [#allocation4], 4294967264 }
 0x11e   :  { %293 = vsyncpa [#allocation3], 1 }
 0x11f   :  { %294 = vsyncpa [#allocation4], 1 }

</bundles_post_ra>
